<compile_context>
chip_gen: v7x
topology: tpu7x:2x2x1
jax: 0.10.0
libtpu: 0.0.40
codegen_flags: <defaults>
</compile_context>

<pallas_src>
import jax
import jax.numpy as jnp
from jax import lax
from jax.experimental import pallas as pl
from jax.experimental.pallas import tpu as pltpu


# ----------------------------- Pallas kernel --------------------------------
def _ds_block_kernel(planes_ref, gmul_ref, gadd_ref, wa_ref, wb_ref, out_ref):
    """Fused downsampling block for one (batch, output-row-tile) grid step.

    planes : (1, TH, W2+1, 6*C_in)  channel-concatenated stride-2 phase planes
             channel order: [a00, a10, b00, a01, a11, b01]  (even-col first)
    gmul   : (1, 1, C_out) f32      sigmoid gate  zs
    gadd   : (1, 1, C_out) f32      (o1 + o2) * zs
    wa     : (6*C_in, C_out)        fused weights for the kj in {0,1} taps
    wb     : (3*C_in, C_out)        fused weights for the kj == 2 taps
    out    : (1, TH*W2, C_out) f32
    """
    th, w2p1, c6 = planes_ref.shape[1], planes_ref.shape[2], planes_ref.shape[3]
    w2 = w2p1 - 1
    c3 = c6 // 2

    # kj in {0,1}: all 6 phase planes, no column shift -> one MXU matmul.
    lhs_a = planes_ref[0, :, 0:w2, :].reshape(th * w2, c6)
    acc = jnp.dot(lhs_a, wa_ref[...], preferred_element_type=jnp.float32)

    # kj == 2: even-col planes (first 3*C_in channels), shifted one column.
    lhs_b = planes_ref[0, :, 1:w2 + 1, 0:c3].reshape(th * w2, c3)
    acc = acc + jnp.dot(lhs_b, wb_ref[...], preferred_element_type=jnp.float32)

    # (acc + o1 + o2) * zs  ==  acc*zs + (o1+o2)*zs ; then SiLU (EUP sigmoid).
    b = acc * gmul_ref[0] + gadd_ref[0]
    out_ref[0] = b * jax.nn.sigmoid(b)


# ------------------------------- wrapper -------------------------------------
def _pick_row_tile(h2, w2, c_width, itemsize, target_bytes=3 * 1024 * 1024):
    """Largest output-row tile TH that divides H2, keeps the (double-buffered)
    input block a few MiB, and keeps the flattened output block sublane
    aligned ((TH*W2) % 8 == 0)."""
    cands = [t for t in range(1, h2 + 1)
             if h2 % t == 0 and ((t * w2) % 8 == 0 or t == h2)]
    fits = [t for t in cands if t * (w2 + 1) * c_width * itemsize <= target_bytes]
    return max(fits) if fits else min(cands)


def downsampling_block(x_nchw, p, *, compute_dtype=jnp.bfloat16):
    B, C_in, H, W = x_nchw.shape
    assert H % 2 == 0 and W % 2 == 0, "Downsampling_block needs even H, W"
    C_out = p["wc"].shape[-1]
    H2, W2 = H // 2, W // 2
    N = H2 * W2

    xf = x_nchw.astype(jnp.float32)
    x_nhwc = jnp.transpose(xf, (0, 2, 3, 1))                      # (B, H, W, C)

    # ---- gate branch in the wrapper (B x C_out work; avoids an M=1 matmul
    #      per spatial tile inside the kernel) -------------------------------
    zs = jax.nn.sigmoid(x_nhwc.mean(axis=(1, 2)) @ p["w3"] + p["b3"])  # (B,Co)
    gate_mul = zs.reshape(B, 1, C_out)
    gate_add = (zs * p["o12"]).reshape(B, 1, C_out)

    # ---- stride-2 phase planes of the padded input, channel-concatenated ---
    x_pad = jnp.pad(x_nhwc, ((0, 0), (1, 1), (1, 1), (0, 0)))
    p00 = x_pad[:, 0::2, 0::2, :]          # even padded rows, even padded cols
    p01 = x_pad[:, 0::2, 1::2, :]          # even padded rows, odd  padded cols
    p10 = x_pad[:, 1::2, 0::2, :]          # odd  padded rows, even padded cols
    p11 = x_pad[:, 1::2, 1::2, :]          # odd  padded rows, odd  padded cols
    planes = jnp.concatenate([
        p00[:, :H2],                       # a00: ki=0, even cols
        p10[:, :H2],                       # a10: ki=1, even cols
        p00[:, 1:H2 + 1],                  # b00: ki=2, even cols
        p01[:, :H2],                       # a01: ki=0, odd  cols
        p11[:, :H2],                       # a11: ki=1, odd  cols
        p01[:, 1:H2 + 1],                  # b01: ki=2, odd  cols
    ], axis=-1).astype(compute_dtype)      # (B, H2, W2+1, 6*C_in)

    # ---- fused weights regrouped for the two in-kernel matmuls -------------
    wc = p["wc"]                                              # (9, Cin, Cout)
    wa = jnp.concatenate([wc[0], wc[3], wc[6], wc[1], wc[4], wc[7]],
                         axis=0).astype(compute_dtype)        # (6*Cin, Cout)
    wb = jnp.concatenate([wc[2], wc[5], wc[8]],
                         axis=0).astype(compute_dtype)        # (3*Cin, Cout)

    C6 = 6 * C_in
    TH = _pick_row_tile(H2, W2, C6, jnp.dtype(compute_dtype).itemsize)
    n_row_tiles = H2 // TH

    gate_spec = pl.BlockSpec((1, 1, C_out), lambda b, t: (b, 0, 0))

    out_flat = pl.pallas_call(
        _ds_block_kernel,
        out_shape=jax.ShapeDtypeStruct((B, N, C_out), jnp.float32),
        grid=(B, n_row_tiles),
        in_specs=[
            pl.BlockSpec((1, TH, W2 + 1, C6), lambda b, t: (b, t, 0, 0)),
            gate_spec, gate_spec,
            pl.BlockSpec((C6, C_out), lambda b, t: (0, 0)),
            pl.BlockSpec((3 * C_in, C_out), lambda b, t: (0, 0)),
        ],
        out_specs=pl.BlockSpec((1, TH * W2, C_out), lambda b, t: (b, t, 0)),
        compiler_params=pltpu.CompilerParams(
            dimension_semantics=("parallel", "parallel"),
            vmem_limit_bytes=32 * 1024 * 1024),
    )(planes, gate_mul, gate_add, wa, wb)

    # back to NCHW
    return out_flat.reshape(B, H2, W2, C_out).transpose(0, 3, 1, 2)


# --------------------------- parameter setup ----------------------------------
def init_params(key, C_in, C_out, eps=1e-5):
    ks = jax.random.split(key, 12)
    # conv weights in PyTorch OIHW layout
    w1_oihw = 0.2 * jax.random.normal(ks[0], (C_out, C_in, 1, 1), jnp.float32)
    w2_oihw = 0.2 * jax.random.normal(ks[1], (C_out, C_in, 3, 3), jnp.float32)
    w3_oihw = 0.2 * jax.random.normal(ks[2], (C_out, C_in, 1, 1), jnp.float32)
    b3 = 0.1 * jax.random.normal(ks[3], (C_out,), jnp.float32)

    # BatchNorm (inference-mode) params for conv1 / conv2
    g1 = 1.0 + 0.1 * jax.random.normal(ks[4], (C_out,), jnp.float32)
    be1 = 0.1 * jax.random.normal(ks[5], (C_out,), jnp.float32)
    m1 = 0.1 * jax.random.normal(ks[6], (C_out,), jnp.float32)
    v1 = jnp.abs(jax.random.normal(ks[7], (C_out,), jnp.float32)) + 0.5
    g2 = 1.0 + 0.1 * jax.random.normal(ks[8], (C_out,), jnp.float32)
    be2 = 0.1 * jax.random.normal(ks[9], (C_out,), jnp.float32)
    m2 = 0.1 * jax.random.normal(ks[10], (C_out,), jnp.float32)
    v2 = jnp.abs(jax.random.normal(ks[11], (C_out,), jnp.float32)) + 0.5

    s1 = g1 / jnp.sqrt(v1 + eps)
    o1 = be1 - m1 * s1
    s2 = g2 / jnp.sqrt(v2 + eps)
    o2 = be2 - m2 * s2

    # Fused weight, tap-major: Wc[3*ki+kj] = (s2*w2)[ki,kj], plus s1*w1/4 on
    # the {1,2}x{1,2} taps (== AvgPool2x2 -> Conv1x1 -> BN1, exact for even
    # H, W).
    w2_kkio = jnp.transpose(w2_oihw, (2, 3, 1, 0))            # (3,3,Cin,Cout)
    wc = w2_kkio * s2[None, None, None, :]
    w1_fold = 0.25 * (w1_oihw[:, :, 0, 0].T * s1[None, :])    # (Cin, Cout)
    wc = wc.at[1:3, 1:3, :, :].add(w1_fold[None, None, :, :])

    return {
        # packed params for the kernel (kept f32; wrapper casts matmul inputs)
        "wc": wc.reshape(9, C_in, C_out),          # fused conv weights
        "o12": (o1 + o2).reshape(1, C_out),        # fused BN offset
        "w3": w3_oihw[:, :, 0, 0].T,               # (Cin, Cout) gate weight
        "b3": b3.reshape(1, C_out),                # gate bias
        # raw params for the pure-JAX reference
        "w1_oihw": w1_oihw, "w2_oihw": w2_oihw, "w3_oihw": w3_oihw,
        "s1v": s1, "o1v": o1, "s2v": s2, "o2v": o2, "b3v": b3,
    }


# --------------------------- pure-JAX reference --------------------------------
def reference(x, p):
    """Exact PyTorch-module math in f32 (unfused branches, lax convolutions)."""
    B, C_in, H, W = x.shape
    dn = ("NCHW", "OIHW", "NCHW")
    xp = x.reshape(B, C_in, H // 2, 2, W // 2, 2).mean(axis=(3, 5))
    c1 = lax.conv_general_dilated(xp, p["w1_oihw"], (1, 1), "VALID",
                                  dimension_numbers=dn)
    x1 = c1 * p["s1v"][None, :, None, None] + p["o1v"][None, :, None, None]
    c2 = lax.conv_general_dilated(x, p["w2_oihw"], (2, 2), ((1, 1), (1, 1)),
                                  dimension_numbers=dn)
    y = c2 * p["s2v"][None, :, None, None] + p["o2v"][None, :, None, None]
    z = x.mean(axis=(2, 3), keepdims=True)
    c3 = lax.conv_general_dilated(z, p["w3_oihw"], (1, 1), "VALID",
                                  dimension_numbers=dn)
    zs = jax.nn.sigmoid(c3 + p["b3v"][None, :, None, None])
    b = (x1 + y) * zs
    return b * jax.nn.sigmoid(b)


if __name__ == "__main__":
    B, C_in, C_out, H, W = 2, 4, 8, 16, 16
    key = jax.random.PRNGKey(0)
    kx, kp = jax.random.split(key)
    x = jax.random.normal(kx, (B, C_in, H, W), jnp.float32)
    params = init_params(kp, C_in, C_out)

    ref = jax.block_until_ready(reference(x, params))

    # 1) f32 compute path: tight check of the fused-weight / phase-plane math.
    out_f32 = jax.block_until_ready(
        downsampling_block(x, params, compute_dtype=jnp.float32))
    assert out_f32.shape == (B, C_out, H // 2, W // 2)
    err_f32 = float(jnp.max(jnp.abs(out_f32 - ref)))
    assert err_f32 < 1e-4, f"f32 path max abs err {err_f32}"

    # 2) default bf16 MXU path: same semantics with bf16-rounded matmul inputs
    #    (f32 accumulation / epilogue), looser tolerance for the bf16 rounding.
    out_bf16 = jax.block_until_ready(downsampling_block(x, params))
    assert out_bf16.shape == (B, C_out, H // 2, W // 2)
    err_bf16 = float(jnp.max(jnp.abs(out_bf16 - ref)))
    assert err_bf16 < 5e-2, f"bf16 path max abs err {err_bf16}"

    print("KERNEL_OK")
</pallas_src>

<mosaic_0001>
module attributes {stable_mosaic.version = 11 : i64} {
  func.func @_ds_block_kernel(%arg0: i32, %arg1: i32, %arg2: memref<1x8x9x24xf32, #tpu.memory_space<vmem>>, %arg3: memref<1x1x8xf32, #tpu.memory_space<vmem>>, %arg4: memref<1x1x8xf32, #tpu.memory_space<vmem>>, %arg5: memref<24x8xf32, #tpu.memory_space<vmem>>, %arg6: memref<12x8xf32, #tpu.memory_space<vmem>>, %arg7: memref<1x64x8xf32, #tpu.memory_space<vmem>>) attributes {dimension_semantics = [#tpu.dimension_semantics<parallel>, #tpu.dimension_semantics<parallel>], iteration_bounds = array<i64: 2, 1>, scalar_prefetch = 0 : i64, scratch_operands = 0 : i64, tpu.core_type = #tpu.core_type<tc>, window_params = [{transform_indices = @transform_0, window_bounds = array<i64: 1, 8, 9, 24>}, {transform_indices = @transform_1, window_bounds = array<i64: 1, 1, 8>}, {transform_indices = @transform_2, window_bounds = array<i64: 1, 1, 8>}, {pipeline_mode = #tpu.pipeline_mode<synchronous>, transform_indices = @transform_3, window_bounds = array<i64: 24, 8>}, {pipeline_mode = #tpu.pipeline_mode<synchronous>, transform_indices = @transform_4, window_bounds = array<i64: 12, 8>}, {transform_indices = @transform_5, window_bounds = array<i64: 1, 64, 8>}]} {
    %c0 = arith.constant 0 : index
    %c0_0 = arith.constant 0 : index
    %c0_1 = arith.constant 0 : index
    %c0_2 = arith.constant 0 : index
    %0 = vector.load %arg2[%c0, %c0_0, %c0_1, %c0_2] : memref<1x8x9x24xf32, #tpu.memory_space<vmem>>, vector<1x8x8x24xf32>
    %1 = vector.shape_cast %0 : vector<1x8x8x24xf32> to vector<8x8x24xf32>
    %2 = vector.shape_cast %1 : vector<8x8x24xf32> to vector<64x24xf32>
    %c0_3 = arith.constant 0 : index
    %c0_4 = arith.constant 0 : index
    %3 = vector.load %arg5[%c0_3, %c0_4] : memref<24x8xf32, #tpu.memory_space<vmem>>, vector<24x8xf32>
    %cst = arith.constant dense<0.000000e+00> : vector<64x8xf32>
    %4 = tpu.matmul %2, %3, %cst {dimension_numbers = #tpu.dot_dimension_numbers<[1], [0], [0], [1], [0, 0, 1, 1], [], []>} : vector<64x24xf32>, vector<24x8xf32>, vector<64x8xf32> -> vector<64x8xf32>
    %c0_5 = arith.constant 0 : index
    %c0_6 = arith.constant 0 : index
    %c1 = arith.constant 1 : index
    %c0_7 = arith.constant 0 : index
    %5 = vector.load %arg2[%c0_5, %c0_6, %c1, %c0_7] : memref<1x8x9x24xf32, #tpu.memory_space<vmem>>, vector<1x8x8x12xf32>
    %6 = vector.shape_cast %5 : vector<1x8x8x12xf32> to vector<8x8x12xf32>
    %7 = vector.shape_cast %6 : vector<8x8x12xf32> to vector<64x12xf32>
    %c0_8 = arith.constant 0 : index
    %c0_9 = arith.constant 0 : index
    %8 = vector.load %arg6[%c0_8, %c0_9] : memref<12x8xf32, #tpu.memory_space<vmem>>, vector<12x8xf32>
    %cst_10 = arith.constant dense<0.000000e+00> : vector<64x8xf32>
    %9 = tpu.matmul %7, %8, %cst_10 {dimension_numbers = #tpu.dot_dimension_numbers<[1], [0], [0], [1], [0, 0, 1, 1], [], []>} : vector<64x12xf32>, vector<12x8xf32>, vector<64x8xf32> -> vector<64x8xf32>
    %10 = arith.addf %4, %9 : vector<64x8xf32>
    %c0_11 = arith.constant 0 : index
    %c0_12 = arith.constant 0 : index
    %c0_13 = arith.constant 0 : index
    %11 = vector.load %arg3[%c0_11, %c0_12, %c0_13] : memref<1x1x8xf32, #tpu.memory_space<vmem>>, vector<1x1x8xf32>
    %12 = vector.shape_cast %11 : vector<1x1x8xf32> to vector<1x8xf32>
    %13 = vector.broadcast %12 : vector<1x8xf32> to vector<64x8xf32>
    %14 = arith.mulf %10, %13 : vector<64x8xf32>
    %c0_14 = arith.constant 0 : index
    %c0_15 = arith.constant 0 : index
    %c0_16 = arith.constant 0 : index
    %15 = vector.load %arg4[%c0_14, %c0_15, %c0_16] : memref<1x1x8xf32, #tpu.memory_space<vmem>>, vector<1x1x8xf32>
    %16 = vector.shape_cast %15 : vector<1x1x8xf32> to vector<1x8xf32>
    %17 = vector.broadcast %16 : vector<1x8xf32> to vector<64x8xf32>
    %18 = arith.addf %14, %17 : vector<64x8xf32>
    %19 = arith.negf %18 : vector<64x8xf32>
    %20 = math.exp %19 : vector<64x8xf32>
    %cst_17 = arith.constant 1.000000e+00 : f32
    %21 = vector.broadcast %cst_17 : f32 to vector<64x8xf32>
    %22 = arith.addf %21, %20 : vector<64x8xf32>
    %23 = arith.divf %21, %22 : vector<64x8xf32>
    %24 = arith.mulf %18, %23 : vector<64x8xf32>
    %c0_18 = arith.constant 0 : index
    %c0_19 = arith.constant 0 : index
    %c0_20 = arith.constant 0 : index
    %25 = vector.load %arg7[%c0_18, %c0_19, %c0_20] : memref<1x64x8xf32, #tpu.memory_space<vmem>>, vector<1x64x8xf32>
    %26 = vector.shape_cast %25 : vector<1x64x8xf32> to vector<64x8xf32>
    %27 = vector.shape_cast %24 : vector<64x8xf32> to vector<1x64x8xf32>
    tpu.vector_store %arg7[%c0_18, %c0_19, %c0_20], %27 {strides = array<i32>} : memref<1x64x8xf32, #tpu.memory_space<vmem>>, vector<1x64x8xf32>,
    return
  }
  func.func @transform_0(%arg0: i32, %arg1: i32) -> (i32, i32, i32, i32) {
    %c0_i32 = arith.constant 0 : i32
    %c0_i32_0 = arith.constant 0 : i32
    %c0_i32_1 = arith.constant 0 : i32
    return %arg0, %arg1, %c0_i32, %c0_i32_0 : i32, i32, i32, i32
  }
  func.func @transform_1(%arg0: i32, %arg1: i32) -> (i32, i32, i32) {
    %c0_i32 = arith.constant 0 : i32
    %c0_i32_0 = arith.constant 0 : i32
    %c0_i32_1 = arith.constant 0 : i32
    return %arg0, %c0_i32, %c0_i32_0 : i32, i32, i32
  }
  func.func @transform_2(%arg0: i32, %arg1: i32) -> (i32, i32, i32) {
    %c0_i32 = arith.constant 0 : i32
    %c0_i32_0 = arith.constant 0 : i32
    %c0_i32_1 = arith.constant 0 : i32
    return %arg0, %c0_i32, %c0_i32_0 : i32, i32, i32
  }
  func.func @transform_3(%arg0: i32, %arg1: i32) -> (i32, i32) {
    %c0_i32 = arith.constant 0 : i32
    %c0_i32_0 = arith.constant 0 : i32
    %c0_i32_1 = arith.constant 0 : i32
    return %c0_i32, %c0_i32_0 : i32, i32
  }
  func.func @transform_4(%arg0: i32, %arg1: i32) -> (i32, i32) {
    %c0_i32 = arith.constant 0 : i32
    %c0_i32_0 = arith.constant 0 : i32
    %c0_i32_1 = arith.constant 0 : i32
    return %c0_i32, %c0_i32_0 : i32, i32
  }
  func.func @transform_5(%arg0: i32, %arg1: i32) -> (i32, i32, i32) {
    %c0_i32 = arith.constant 0 : i32
    %c0_i32_0 = arith.constant 0 : i32
    return %arg0, %arg1, %c0_i32 : i32, i32, i32
  }
}

</mosaic_0001>

<bundles_post_ra>
// kernel: tpu_custom_call.1
= control target key start
LH: loop header
LB: loop body
LE: loop exit
PB: predicated region body
PF: predicated region fallthrough
CT: control target
= control target key end

     0   :  { %s1008_s18 = smov 0   ;;  %s1010_s19 = smov 0   ;;  %s1126_s0 = inlined_call_operand.vmem [shape: f32[2,8,9,24], index: 0, kind: input, shape index: {}]   ;;  %s1127_s1 = inlined_call_operand.vmem [shape: f32[2,1,8], index: 1, kind: input, shape index: {}]   ;;  %s1128_s2 = inlined_call_operand.vmem [shape: f32[2,1,8], index: 2, kind: input, shape index: {}]   ;;  %s1129_s3 = inlined_call_operand.vmem [shape: f32[24,8], index: 3, kind: input, shape index: {}]   ;;  %s1130_s4 = inlined_call_operand.vmem [shape: f32[12,8], index: 4, kind: input, shape index: {}]   ;;  %s1131_s5 = inlined_call_operand.vmem [shape: f32[2,64,8], index: 5, kind: output, shape index: {}]  }
   0x1   :  { %s1012_s20 = smov 0  }
   0x2 LB: > { %s27_s21 = sadd.s32 1, %s971_s19  ;;  %p787_p0 = scmp.ge.s32.totalorder %s975_s20, 1  ;;  %s975_s20 = sphi %s1012_s20, %s15_s20   ;;  %s971_s19 = sphi %s1010_s19, %s1133_s19   ;;  %s967_s18 = sphi %s1008_s18, %s1132_s18  }
   0x3   : > { %p29_p1 = scmp.ge.s32.totalorder %s27_s21, 2  ;;  %p225_p2 = scmp.lt.s32.totalorder %s975_s20, 3 }
   0x5   : > { %s1135_s21 = smov (%p29_p1, %s27_s21), 0  ;;  %p226_p3 = pnand %p787_p0, %p225_p2 }
   0x6   : > { %v303_v0 = vld [vmem:[%s1129_s3] sm:$0xff] (!%p226_p3)  ;;  %v304_v1 = vld [vmem:[%s1129_s3 + $0x8] sm:$0xff] (!%p226_p3)  ;;  %vm341_vm0 = vcmask (!%p226_p3), 1043456   ;;  %p269_p4 = scmp.lt.s32.totalorder (!%p226_p3), %s967_s18, 1  ;;  %vm977_vm1 = vmmov (!%p226_p3), 1   ;;  %v305_v6 = vld [vmem:[%s1129_s3 + $0x10] sm:$0xff] (!%p226_p3) }
   0x7   : > { %229 = sbr.rel (%p226_p3) target bundleno = 282 (0x11a), region = 40  ;;  %v314_v2 = vld [vmem:[%s1130_s4] sm:$0xff] (!%p226_p3)  ;;  %v884_v3 = vpack.c.bf16 (!%p226_p3), %v304_v1, %v303_v0  ;;  %v315_v4 = vld [vmem:[%s1130_s4 + $0x8] sm:$0xf] (!%p226_p3)  ;;  %vm879_vm2 = vmpackc.low (!%p226_p3), %vm341_vm0, %vm977_vm1  ;;  %vm316_vm3 = vcmask (!%p226_p3), 97280   ;;  %vm450_vm4 = vcmask (!%p226_p3), 195584  }
   0x8   : > { %v878_v5 = vpack.c.bf16 (!%p226_p3), %v315_v4, %v314_v2  ;;  %vm666_vm5 = vcmask (!%p226_p3), 64512  }
   0x9   : > { %885 = vmatprep.subr.bf16.mxu0 (!%p226_p3), %v884_v3 }
   0xa   : > { %880 = vmatprep.subr.msk.bf16.mxu1 (!%p226_p3), %vm879_vm2, %v878_v5  ;;  %887 = vmatpush3.bf16.msra.mxu0 (!%p226_p3), %v884_v3 }
   0xb   : > { %883 = vmatpush3.bf16.msk.msra.mxu1 (!%p226_p3), %vm879_vm2, %v878_v5  ;;  %864 = vmatprep.subr.mxu0 (!%p226_p3), %v305_v6 }
   0xe   : > { %s1137_s18 = smov (!%p269_p4, %s967_s18), 1  ;;  %865 = vmatpush3.msra.mxu0 %v305_v6 }
   0xf   : > { %s821_s7 = sshll.u32 %s1137_s18, 7  ;;  %s281_s13 = scalar_lea.vmem %s1127_s1, %s1137_s18 }
  0x10   : > { %s1047_s10 = scalar_lea.vmem %s1126_s0, %s821_s7  ;;  %s284_s16 = scalar_lea.vmem %s1128_s2, %s1137_s18  ;;  %v809_v26 = vld [vmem:[%s281_s13] ss:$0 sm:$0xff] }
  0x11   : > { %v306_v7 = vld [vmem:[%s1047_s10 + $0x1] sm:$0xff]  ;;  %v307_v8 = vld [vmem:[%s1047_s10 + $0x11] sm:$0xff]  ;;  %v810_v29 = vld [vmem:[%s284_s16] ss:$0 sm:$0xff]  ;;  %s822_s17 = sshll.u32 %s1137_s18, 6 }
  0x12   : > { %v295_v9 = vld [vmem:[%s1047_s10] sm:$0xff]  ;;  %848 = vmatprep.mubr.msk.f32.mxu1 %vm316_vm3, %v306_v7  ;;  %v296_v10 = vld [vmem:[%s1047_s10 + $0x10] sm:$0xff]  ;;  %s293_s24 = scalar_lea.vmem %s1131_s5, %s822_s17 }
  0x13   : > { %866 = vmatprep.mubr.msk.f32.mxu0 %vm450_vm4, %v295_v9  ;;  %v308_v11 = vld [vmem:[%s1047_s10 + $0x21] sm:$0xff]  ;;  %849 = vmatmul.mubr.msk.f32.vlgmr.msra.gmra.mrb[0].mxu1 %vm316_vm3, %v307_v8  ;;  %v309_v13 = vld [vmem:[%s1047_s10 + $0x31] sm:$0xff] }
  0x14   : > { %v297_v12 = vld [vmem:[%s1047_s10 + $0x20] sm:$0xff]  ;;  %867 = vmatmul.mubr.msk.f32.vlgmr.msra.gmra.mrb[0].mxu0 %vm450_vm4, %v296_v10  ;;  %851 = vmatprep.mubr.msk.f32.mxu1 %vm316_vm3, %v308_v11  ;;  %v298_v14 = vld [vmem:[%s1047_s10 + $0x30] sm:$0xff] }
  0x15   : > { %869 = vmatprep.mubr.msk.f32.mxu0 %vm450_vm4, %v297_v12  ;;  %v310_v15 = vld [vmem:[%s1047_s10 + $0x41] sm:$0xff]  ;;  %v311_v17 = vld [vmem:[%s1047_s10 + $0x51] sm:$0xff] }
  0x16   : > { %v299_v16 = vld [vmem:[%s1047_s10 + $0x40] sm:$0xff]  ;;  %v300_v18 = vld [vmem:[%s1047_s10 + $0x50] sm:$0xff] }
  0x17   : > { %852 = vmatmul.mubr.msk.f32.gmra.mrb[2].mxu1 %vm316_vm3, %v309_v13  ;;  %v312_v19 = vld [vmem:[%s1047_s10 + $0x61] sm:$0xff]  ;;  %v313_v21 = vld [vmem:[%s1047_s10 + $0x71] sm:$0xff] }
  0x18   : > { %870 = vmatmul.mubr.msk.f32.gmra.mrb[2].mxu0 %vm450_vm4, %v298_v14  ;;  %854 = vmatprep.mubr.msk.f32.mxu1 %vm316_vm3, %v310_v15  ;;  %v301_v20 = vld [vmem:[%s1047_s10 + $0x60] sm:$0xff]  ;;  %v302_v22 = vld [vmem:[%s1047_s10 + $0x70] sm:$0xff] }
  0x19   : > { %872 = vmatprep.mubr.msk.f32.mxu0 %vm450_vm4, %v299_v16 }
  0x1b   : > { %855 = vmatmul.mubr.msk.f32.gmra.mrb[4].mxu1 %vm316_vm3, %v311_v17 }
  0x1c   : > { %873 = vmatmul.mubr.msk.f32.gmra.mrb[4].mxu0 %vm450_vm4, %v300_v18  ;;  %857 = vmatprep.mubr.msk.f32.mxu1 %vm316_vm3, %v312_v19 }
  0x1d   : > { %875 = vmatprep.mubr.msk.f32.mxu0 %vm450_vm4, %v301_v20 }
  0x1f   : > { %858 = vmatmul.mubr.msk.f32.gmra.mrb[6].mxu1 %vm316_vm3, %v313_v21 }
  0x20   : > { %876 = vmatmul.mubr.msk.f32.gmra.mrb[6].mxu0 %vm450_vm4, %v302_v22 }
  0xe6   : > { %v850_v23 = vpop.f32.mrb[0].mxu1 }
  0xe7   : > { %v411_v24 = vpop.f32.mrb[1].mxu1  ;;  %v868_v25 = vpop.f32.mrb[0].mxu0 }
  0xe8   : > { %v547_v27 = vadd.f32 %v868_v25, %v850_v23  ;;  %v541_v28 = vpop.f32.mrb[1].mxu0 }
  0xe9   : > { %v542_v30 = vadd.f32 %v541_v28, %v411_v24 }
  0xea   : > { %v588_v31 = vmul.f32 %v809_v26, %v547_v27  ;;  %v853_v32 = vpop.f32.mrb[2].mxu1 }
  0xeb   : > { %v587_v33 = vmul.f32 %v809_v26, %v542_v30  ;;  %v421_v34 = vpop.f32.mrb[3].mxu1  ;;  %v871_v35 = vpop.f32.mrb[2].mxu0 }
  0xec   : > { %v1089_v36 = vadd.f32 %v810_v29, %v588_v31  ;;  %v557_v37 = vadd.f32 %v871_v35, %v853_v32  ;;  %v551_v38 = vpop.f32.mrb[3].mxu0 }
  0xed   : > { %v1091_v39 = vadd.f32 %v810_v29, %v587_v33  ;;  %v552_v40 = vadd.f32 %v551_v38, %v421_v34 }
  0xee   : > { %v812_v41 = vmul.f32 -1.442695, %v1089_v36  ;;  %v590_v42 = vmul.f32 %v809_v26, %v557_v37  ;;  %v856_v43 = vpop.f32.mrb[4].mxu1 }
  0xef   : > { %v811_v44 = vmul.f32 -1.442695, %v1091_v39  ;;  %v589_v45 = vmul.f32 %v809_v26, %v552_v40  ;;  %v431_v46 = vpop.f32.mrb[5].mxu1  ;;  %v874_v47 = vpop.f32.mrb[4].mxu0 }
  0xf0   : > { %921 = vpow2.f32 %v812_v41  ;;  %v1095_v48 = vadd.f32 %v810_v29, %v590_v42  ;;  %v567_v49 = vadd.f32 %v874_v47, %v856_v43  ;;  %v561_v50 = vpop.f32.mrb[5].mxu0 }
  0xf1   : > { %923 = vpow2.f32 %v811_v44  ;;  %v1097_v51 = vadd.f32 %v810_v29, %v589_v45  ;;  %v562_v52 = vadd.f32 %v561_v50, %v431_v46 }
  0xf2   : > { %v814_v53 = vmul.f32 -1.442695, %v1095_v48  ;;  %v592_v54 = vmul.f32 %v809_v26, %v567_v49  ;;  %v859_v55 = vpop.f32.mrb[6].mxu1 }
  0xf3   : > { %v813_v56 = vmul.f32 -1.442695, %v1097_v51  ;;  %v591_v57 = vmul.f32 %v809_v26, %v562_v52  ;;  %v441_v58 = vpop.f32.mrb[7].mxu1  ;;  %v877_v59 = vpop.f32.mrb[6].mxu0 }
  0xf4   : > { %925 = vpow2.f32 %v814_v53  ;;  %v607_v60 = vadd.f32 %v810_v29, %v592_v54  ;;  %v577_v61 = vadd.f32 %v877_v59, %v859_v55  ;;  %v571_v62 = vpop.f32.mrb[7].mxu0 }
  0xf5   : > { %927 = vpow2.f32 %v813_v56  ;;  %v606_v63 = vadd.f32 %v810_v29, %v591_v57  ;;  %v572_v0 = vadd.f32 %v571_v62, %v441_v58 }
  0xf6   : > { %v816_v1 = vmul.f32 -1.442695, %v607_v60  ;;  %v594_v2 = vmul.f32 %v809_v26, %v577_v61 }
  0xf7   : > { %v815_v3 = vmul.f32 -1.442695, %v606_v63  ;;  %v593_v4 = vmul.f32 %v809_v26, %v572_v0 }
  0xf8   : > { %929 = vpow2.f32 %v816_v1  ;;  %v609_v5 = vadd.f32 %v810_v29, %v594_v2 }
  0xf9   : > { %931 = vpow2.f32 %v815_v3  ;;  %v608_v6 = vadd.f32 %v810_v29, %v593_v4 }
  0xfa   : > { %v922_v7 = vpop.eup %921  ;;  %v818_v8 = vmul.f32 -1.442695, %v609_v5 }
  0xfb   : > { %v924_v9 = vpop.eup %923  ;;  %v635_v10 = vadd.f32 1.0, %v922_v7  ;;  %v817_v11 = vmul.f32 -1.442695, %v608_v6 }
  0xfc   : > { %v634_v12 = vadd.f32 1.0, %v924_v9  ;;  %933 = vpow2.f32 %v818_v8 }
  0xfd   : > { %935 = vrcp.f32 %v635_v10 }
  0xfe   : > { %v926_v13 = vpop.eup %925  ;;  %937 = vrcp.f32 %v634_v12 }
  0xff   : > { %v928_v14 = vpop.eup %927  ;;  %v637_v15 = vadd.f32 1.0, %v926_v13  ;;  %939 = vpow2.f32 %v817_v11 }
 0x100   : > { %v636_v16 = vadd.f32 1.0, %v928_v14 }
 0x101   : > { %941 = vrcp.f32 %v637_v15 }
 0x102   : > { %v930_v17 = vpop.eup %929  ;;  %943 = vrcp.f32 %v636_v16 }
 0x103   : > { %v932_v18 = vpop.eup %931  ;;  %v639_v19 = vadd.f32 1.0, %v930_v17 }
 0x104   : > { %v638_v20 = vadd.f32 1.0, %v932_v18 }
 0x105   : > { %945 = vrcp.f32 %v639_v19 }
 0x106   : > { %v934_v21 = vpop.eup %933  ;;  %947 = vrcp.f32 %v638_v20 }
 0x107   : > { %v936_v22 = vpop.eup %935  ;;  %v641_v23 = vadd.f32 1.0, %v934_v21 }
 0x108   : > { %v938_v24 = vpop.eup %937  ;;  %v659_v25 = vmul.f32 %v936_v22, %v1089_v36 }
 0x109   : > { %v940_v26 = vpop.eup %939  ;;  %v658_v27 = vmul.f32 %v938_v24, %v1091_v39  ;;  %949 = vrcp.f32 %v641_v23 }
 0x10a   : > { %668 = vst.msk [vmem:[%s293_s24 + $0x8] sm:$0xff] %vm666_vm5, %v659_v25  ;;  %v640_v28 = vadd.f32 1.0, %v940_v26 }
 0x10b   : > { %v942_v29 = vpop.eup %941  ;;  %667 = vst.msk [vmem:[%s293_s24] sm:$0xff] %vm666_vm5, %v658_v27 }
 0x10c   : > { %v944_v30 = vpop.eup %943  ;;  %v661_v31 = vmul.f32 %v942_v29, %v1095_v48  ;;  %951 = vrcp.f32 %v640_v28 }
 0x10d   : > { %v660_v32 = vmul.f32 %v944_v30, %v1097_v51 }
 0x10e   : > { %670 = vst.msk [vmem:[%s293_s24 + $0x18] sm:$0xff] %vm666_vm5, %v661_v31 }
 0x10f   : > { %v946_v33 = vpop.eup %945  ;;  %669 = vst.msk [vmem:[%s293_s24 + $0x10] sm:$0xff] %vm666_vm5, %v660_v32 }
 0x110   : > { %v948_v34 = vpop.eup %947  ;;  %v663_v35 = vmul.f32 %v946_v33, %v607_v60 }
 0x111   : > { %v662_v36 = vmul.f32 %v948_v34, %v606_v63 }
 0x112   : > { %672 = vst.msk [vmem:[%s293_s24 + $0x28] sm:$0xff] %vm666_vm5, %v663_v35 }
 0x113   : > { %v950_v37 = vpop.eup %949  ;;  %671 = vst.msk [vmem:[%s293_s24 + $0x20] sm:$0xff] %vm666_vm5, %v662_v36 }
 0x114   : > { %v665_v38 = vmul.f32 %v950_v37, %v609_v5 }
 0x116   : > { %v952_v39 = vpop.eup %951  ;;  %674 = vst.msk [vmem:[%s293_s24 + $0x38] sm:$0xff] %vm666_vm5, %v665_v38 }
 0x117   : > { %v664_v40 = vmul.f32 %v952_v39, %v608_v6 }
 0x119   : > { %673 = vst.msk [vmem:[%s293_s24 + $0x30] sm:$0xff] %vm666_vm5, %v664_v40 }
 0x11a PF: > { %s15_s20 = sadd.s32 1, %s975_s20   ;;  %s1132_s18 = smov %s971_s19 }
 0x11b   : > { %p12_p5 = scmp.ge.s32.totalorder %s15_s20, 4   ;;  %s1133_s19 = smov %s1135_s21 }
 0x11d   :  { %14 = sbr.rel (!%p12_p5) target bundleno = 2 (0x2), region = 76 }

</bundles_post_ra>
